<compile_context>
chip_gen: v7x
topology: tpu7x:2x2x1
jax: 0.10.0
libtpu: 0.0.40
codegen_flags: <defaults>
</compile_context>

<pallas_src>
import functools

import jax
import jax.numpy as jnp
from jax.experimental import pallas as pl
from jax.experimental.pallas import tpu as pltpu

ALPHA = 1.0
BN_EPS = 1e-5
LANE = 128
SUBLANE = 8


def _round_up(n, m):
    return ((n + m - 1) // m) * m


def _pad2d(a, rows, cols):
    return jnp.pad(a, ((0, rows - a.shape[0]), (0, cols - a.shape[1])))


def dcn_kernel(n_clusters,
               x_ref,
               w1_ref, b1_ref, w2_ref, b2_ref, w3_ref, b3_ref,
               ct_ref, c2_ref,
               feat_ref, q_ref):
    """One batch tile of the forward pass, fully in VMEM.

    Parameter refs carry BN scale/shift + bias already folded into (W, b) and
    are zero-padded to lane-dense widths. ct_ref is centers^T (D3_pad, K_pad),
    c2_ref is ||c||^2 (1, K_pad) with zeros in padded columns.
    """
    h = x_ref[...]  # (TB, D_in_pad) f32

    # --- feature extractor: 3 x (Linear+BN folded -> ReLU -> Dropout(id)) ---
    h = jnp.maximum(
        jnp.dot(h, w1_ref[...], preferred_element_type=jnp.float32) + b1_ref[...], 0.0)
    h = jnp.maximum(
        jnp.dot(h, w2_ref[...], preferred_element_type=jnp.float32) + b2_ref[...], 0.0)
    h = jnp.maximum(
        jnp.dot(h, w3_ref[...], preferred_element_type=jnp.float32) + b3_ref[...], 0.0)
    feat_ref[...] = h  # lane-dense (TB, D3_pad) store

    # --- Student's t soft assignment ---
    fc = jnp.dot(h, ct_ref[...], preferred_element_type=jnp.float32)  # (TB, K_pad)
    f2 = jnp.sum(h * h, axis=1, keepdims=True)                        # (TB, 1)
    # clamp: fp cancellation can make the squared distance slightly negative
    dist = jnp.maximum(f2 + c2_ref[...] - 2.0 * fc, 0.0)
    if ALPHA != 1.0:
        dist = dist * (1.0 / ALPHA)
    q = pl.reciprocal(1.0 + dist, approx=True)         # EUP vrcp
    power = (ALPHA + 1.0) * 0.5
    if power != 1.0:  # with ALPHA == 1.0 the pow() is an exact identity
        q = jnp.power(q, power)
    # zero the padded (phantom) cluster columns before normalizing
    col = jax.lax.broadcasted_iota(jnp.int32, q.shape, 1)
    q = jnp.where(col < n_clusters, q, 0.0)
    q = q * pl.reciprocal(jnp.sum(q, axis=1, keepdims=True), approx=True)
    q_ref[...] = q  # lane-dense (TB, K_pad) store


def fold_params(params):
    """Fold eval-mode BN + Linear bias into per-layer (W, b); transpose to
    (in, out); zero-pad all dims to multiples of 128 (lane-dense)."""
    folded = {}
    for j in (1, 2, 3):
        w = params[f"w{j}"]          # (out, in)  torch layout
        b = params[f"b{j}"]          # (out,)
        scale = params[f"gamma{j}"] / jnp.sqrt(params[f"var{j}"] + BN_EPS)
        w_f = w.T * scale[None, :]                       # (in, out)
        b_f = (b - params[f"mean{j}"]) * scale + params[f"beta{j}"]
        in_p = _round_up(w_f.shape[0], LANE)
        out_p = _round_up(w_f.shape[1], LANE)
        folded[f"w{j}"] = _pad2d(w_f, in_p, out_p)
        folded[f"b{j}"] = _pad2d(b_f[None, :], 1, out_p)
    c = params["centers"]            # (K, D3)
    k, d3 = c.shape
    k_p = _round_up(k, LANE)
    d3_p = _round_up(d3, LANE)
    folded["ct"] = _pad2d(c.T, d3_p, k_p)                                # (D3_pad, K_pad)
    folded["c2"] = _pad2d(jnp.sum(c * c, axis=1)[None, :], 1, k_p)        # (1, K_pad)
    folded["n_clusters"] = k
    folded["d3"] = d3
    return folded


def deep_clustering_forward(x, folded):
    B, _ = x.shape
    k = folded["n_clusters"]
    d3 = folded["d3"]
    d_in_p = folded["w1"].shape[0]
    d1_p = folded["w1"].shape[1]
    d2_p = folded["w2"].shape[1]
    d3_p = folded["w3"].shape[1]
    k_p = folded["ct"].shape[1]

    # Batch tiling: resident weights, pipelined x/feat/q tiles, megacore-parallel.
    tile_b = min(_round_up(B, SUBLANE), 256)
    b_p = _round_up(B, tile_b)
    x_p = _pad2d(x.astype(jnp.float32), b_p, d_in_p)
    grid = (b_p // tile_b,)

    def resident(shape):
        return pl.BlockSpec(shape, lambda i: (0, 0))

    in_specs = [
        pl.BlockSpec((tile_b, d_in_p), lambda i: (i, 0)),
        resident(folded["w1"].shape), resident(folded["b1"].shape),
        resident(folded["w2"].shape), resident(folded["b2"].shape),
        resident(folded["w3"].shape), resident(folded["b3"].shape),
        resident(folded["ct"].shape), resident(folded["c2"].shape),
    ]
    out_specs = (
        pl.BlockSpec((tile_b, d3_p), lambda i: (i, 0)),
        pl.BlockSpec((tile_b, k_p), lambda i: (i, 0)),
    )

    param_arrays = [folded[n] for n in ("w1", "b1", "w2", "b2", "w3", "b3", "ct", "c2")]
    param_bytes = sum(int(a.size) * 4 for a in param_arrays)
    flops = 2 * b_p * (d_in_p * d1_p + d1_p * d2_p + d2_p * d3_p + d3_p * k_p)
    bytes_accessed = param_bytes + 4 * (b_p * d_in_p + b_p * d3_p + b_p * k_p)

    feat_p, q_p = pl.pallas_call(
        functools.partial(dcn_kernel, k),
        out_shape=(
            jax.ShapeDtypeStruct((b_p, d3_p), jnp.float32),
            jax.ShapeDtypeStruct((b_p, k_p), jnp.float32),
        ),
        grid=grid,
        in_specs=in_specs,
        out_specs=out_specs,
        compiler_params=pltpu.CompilerParams(dimension_semantics=("parallel",)),
        cost_estimate=pl.CostEstimate(
            flops=flops,
            transcendentals=b_p * k_p,
            bytes_accessed=bytes_accessed,
        ),
    )(
        x_p,
        folded["w1"], folded["b1"],
        folded["w2"], folded["b2"],
        folded["w3"], folded["b3"],
        folded["ct"], folded["c2"],
    )
    return feat_p[:B, :d3], q_p[:B, :k]


def init_params(key, input_dim, hidden_dims, n_clusters):
    """Deterministic synthetic parameters in torch-like layout."""
    params = {}
    dims = [input_dim] + list(hidden_dims)
    for i in range(3):
        kin, kout = dims[i], dims[i + 1]
        key, kw, kb, kg, kbe, km, kv = jax.random.split(key, 7)
        params[f"w{i+1}"] = jax.random.normal(kw, (kout, kin), jnp.float32) / jnp.sqrt(kin)
        params[f"b{i+1}"] = 0.1 * jax.random.normal(kb, (kout,), jnp.float32)
        params[f"gamma{i+1}"] = 1.0 + 0.1 * jax.random.normal(kg, (kout,), jnp.float32)
        params[f"beta{i+1}"] = 0.1 * jax.random.normal(kbe, (kout,), jnp.float32)
        params[f"mean{i+1}"] = 0.1 * jax.random.normal(km, (kout,), jnp.float32)
        params[f"var{i+1}"] = 1.0 + 0.1 * jax.random.uniform(kv, (kout,), jnp.float32)
    key, kc = jax.random.split(key)
    d3 = dims[-1]
    std = jnp.sqrt(2.0 / (n_clusters + d3))  # xavier_normal_
    params["centers"] = std * jax.random.normal(kc, (n_clusters, d3), jnp.float32)
    return params


def reference_forward(x, params):
    """Pure-JAX eval-mode reference (matches the PyTorch module in eval())."""
    h = x
    for j in (1, 2, 3):
        h = h @ params[f"w{j}"].T + params[f"b{j}"]
        scale = params[f"gamma{j}"] / jnp.sqrt(params[f"var{j}"] + BN_EPS)
        h = (h - params[f"mean{j}"]) * scale + params[f"beta{j}"]
        h = jnp.maximum(h, 0.0)
    c = params["centers"]
    dist = jnp.sum((h[:, None, :] - c[None, :, :]) ** 2, axis=2)
    q = 1.0 / (1.0 + dist / ALPHA)
    q = q ** ((ALPHA + 1.0) / 2.0)
    q = q / jnp.sum(q, axis=1, keepdims=True)
    return h, q


if __name__ == "__main__":
    B = 8
    INPUT_DIM = 64
    HIDDEN_DIMS = [128, 64, 32]
    N_CLUSTERS = 8

    key = jax.random.PRNGKey(0)
    key, kx = jax.random.split(key)
    x = jax.random.normal(kx, (B, INPUT_DIM), jnp.float32)
    params = init_params(key, INPUT_DIM, HIDDEN_DIMS, N_CLUSTERS)

    folded = fold_params(params)
    features, q = deep_clustering_forward(x, folded)
    features = jax.block_until_ready(features)
    q = jax.block_until_ready(q)

    assert features.shape == (B, HIDDEN_DIMS[-1]) and q.shape == (B, N_CLUSTERS)
    assert bool(jnp.all(jnp.isfinite(features))) and bool(jnp.all(jnp.isfinite(q)))
    # q rows are probabilities (approx reciprocal -> slightly loose tolerance)
    assert bool(jnp.allclose(jnp.sum(q, axis=1), 1.0, atol=5e-3))

    feat_want, q_want = reference_forward(x, params)
    assert bool(jnp.allclose(features, feat_want, rtol=3e-2, atol=3e-2))
    assert bool(jnp.allclose(q, q_want, rtol=3e-2, atol=3e-2))

    print("KERNEL_OK")
</pallas_src>

<mosaic_0001>
module attributes {stable_mosaic.version = 11 : i64} {
  func.func @dcn_kernel(%arg0: i32, %arg1: memref<8x128xf32, #tpu.memory_space<vmem>>, %arg2: memref<128x128xf32, #tpu.memory_space<vmem>>, %arg3: memref<1x128xf32, #tpu.memory_space<vmem>>, %arg4: memref<128x128xf32, #tpu.memory_space<vmem>>, %arg5: memref<1x128xf32, #tpu.memory_space<vmem>>, %arg6: memref<128x128xf32, #tpu.memory_space<vmem>>, %arg7: memref<1x128xf32, #tpu.memory_space<vmem>>, %arg8: memref<128x128xf32, #tpu.memory_space<vmem>>, %arg9: memref<1x128xf32, #tpu.memory_space<vmem>>, %arg10: memref<8x128xf32, #tpu.memory_space<vmem>>, %arg11: memref<8x128xf32, #tpu.memory_space<vmem>>) attributes {dimension_semantics = [#tpu.dimension_semantics<parallel>], iteration_bounds = array<i64: 1>, scalar_prefetch = 0 : i64, scratch_operands = 0 : i64, tpu.core_type = #tpu.core_type<tc>, window_params = [{transform_indices = @transform_0, window_bounds = array<i64: 8, 128>}, {pipeline_mode = #tpu.pipeline_mode<synchronous>, transform_indices = @transform_1, window_bounds = array<i64: 128, 128>}, {pipeline_mode = #tpu.pipeline_mode<synchronous>, transform_indices = @transform_2, window_bounds = array<i64: 1, 128>}, {pipeline_mode = #tpu.pipeline_mode<synchronous>, transform_indices = @transform_3, window_bounds = array<i64: 128, 128>}, {pipeline_mode = #tpu.pipeline_mode<synchronous>, transform_indices = @transform_4, window_bounds = array<i64: 1, 128>}, {pipeline_mode = #tpu.pipeline_mode<synchronous>, transform_indices = @transform_5, window_bounds = array<i64: 128, 128>}, {pipeline_mode = #tpu.pipeline_mode<synchronous>, transform_indices = @transform_6, window_bounds = array<i64: 1, 128>}, {pipeline_mode = #tpu.pipeline_mode<synchronous>, transform_indices = @transform_7, window_bounds = array<i64: 128, 128>}, {pipeline_mode = #tpu.pipeline_mode<synchronous>, transform_indices = @transform_8, window_bounds = array<i64: 1, 128>}, {transform_indices = @transform_9, window_bounds = array<i64: 8, 128>}, {transform_indices = @transform_10, window_bounds = array<i64: 8, 128>}]} {
    %c0 = arith.constant 0 : index
    %c0_0 = arith.constant 0 : index
    %0 = vector.load %arg1[%c0, %c0_0] : memref<8x128xf32, #tpu.memory_space<vmem>>, vector<8x128xf32>
    %c0_1 = arith.constant 0 : index
    %c0_2 = arith.constant 0 : index
    %1 = vector.load %arg2[%c0_1, %c0_2] : memref<128x128xf32, #tpu.memory_space<vmem>>, vector<128x128xf32>
    %cst = arith.constant dense<0.000000e+00> : vector<8x128xf32>
    %2 = tpu.matmul %0, %1, %cst {dimension_numbers = #tpu.dot_dimension_numbers<[1], [0], [0], [1], [0, 0, 1, 1], [], []>} : vector<8x128xf32>, vector<128x128xf32>, vector<8x128xf32> -> vector<8x128xf32>
    %c0_3 = arith.constant 0 : index
    %c0_4 = arith.constant 0 : index
    %3 = vector.load %arg3[%c0_3, %c0_4] : memref<1x128xf32, #tpu.memory_space<vmem>>, vector<1x128xf32>
    %4 = vector.broadcast %3 : vector<1x128xf32> to vector<8x128xf32>
    %5 = arith.addf %2, %4 : vector<8x128xf32>
    %cst_5 = arith.constant 0.000000e+00 : f32
    %6 = vector.broadcast %cst_5 : f32 to vector<8x128xf32>
    %7 = arith.maximumf %5, %6 : vector<8x128xf32>
    %c0_6 = arith.constant 0 : index
    %c0_7 = arith.constant 0 : index
    %8 = vector.load %arg4[%c0_6, %c0_7] : memref<128x128xf32, #tpu.memory_space<vmem>>, vector<128x128xf32>
    %cst_8 = arith.constant dense<0.000000e+00> : vector<8x128xf32>
    %9 = tpu.matmul %7, %8, %cst_8 {dimension_numbers = #tpu.dot_dimension_numbers<[1], [0], [0], [1], [0, 0, 1, 1], [], []>} : vector<8x128xf32>, vector<128x128xf32>, vector<8x128xf32> -> vector<8x128xf32>
    %c0_9 = arith.constant 0 : index
    %c0_10 = arith.constant 0 : index
    %10 = vector.load %arg5[%c0_9, %c0_10] : memref<1x128xf32, #tpu.memory_space<vmem>>, vector<1x128xf32>
    %11 = vector.broadcast %10 : vector<1x128xf32> to vector<8x128xf32>
    %12 = arith.addf %9, %11 : vector<8x128xf32>
    %cst_11 = arith.constant 0.000000e+00 : f32
    %13 = vector.broadcast %cst_11 : f32 to vector<8x128xf32>
    %14 = arith.maximumf %12, %13 : vector<8x128xf32>
    %c0_12 = arith.constant 0 : index
    %c0_13 = arith.constant 0 : index
    %15 = vector.load %arg6[%c0_12, %c0_13] : memref<128x128xf32, #tpu.memory_space<vmem>>, vector<128x128xf32>
    %cst_14 = arith.constant dense<0.000000e+00> : vector<8x128xf32>
    %16 = tpu.matmul %14, %15, %cst_14 {dimension_numbers = #tpu.dot_dimension_numbers<[1], [0], [0], [1], [0, 0, 1, 1], [], []>} : vector<8x128xf32>, vector<128x128xf32>, vector<8x128xf32> -> vector<8x128xf32>
    %c0_15 = arith.constant 0 : index
    %c0_16 = arith.constant 0 : index
    %17 = vector.load %arg7[%c0_15, %c0_16] : memref<1x128xf32, #tpu.memory_space<vmem>>, vector<1x128xf32>
    %18 = vector.broadcast %17 : vector<1x128xf32> to vector<8x128xf32>
    %19 = arith.addf %16, %18 : vector<8x128xf32>
    %cst_17 = arith.constant 0.000000e+00 : f32
    %20 = vector.broadcast %cst_17 : f32 to vector<8x128xf32>
    %21 = arith.maximumf %19, %20 : vector<8x128xf32>
    %c0_18 = arith.constant 0 : index
    %c0_19 = arith.constant 0 : index
    %22 = vector.load %arg10[%c0_18, %c0_19] : memref<8x128xf32, #tpu.memory_space<vmem>>, vector<8x128xf32>
    tpu.vector_store %arg10[%c0_18, %c0_19], %21 {strides = array<i32>} : memref<8x128xf32, #tpu.memory_space<vmem>>, vector<8x128xf32>,
    %c0_20 = arith.constant 0 : index
    %c0_21 = arith.constant 0 : index
    %23 = vector.load %arg8[%c0_20, %c0_21] : memref<128x128xf32, #tpu.memory_space<vmem>>, vector<128x128xf32>
    %cst_22 = arith.constant dense<0.000000e+00> : vector<8x128xf32>
    %24 = tpu.matmul %21, %23, %cst_22 {dimension_numbers = #tpu.dot_dimension_numbers<[1], [0], [0], [1], [0, 0, 1, 1], [], []>} : vector<8x128xf32>, vector<128x128xf32>, vector<8x128xf32> -> vector<8x128xf32>
    %25 = arith.mulf %21, %21 : vector<8x128xf32>
    %cst_23 = arith.constant dense<0.000000e+00> : vector<8xf32>
    %26 = vector.multi_reduction <add>, %25, %cst_23 [1] : vector<8x128xf32> to vector<8xf32>
    %27 = vector.shape_cast %26 : vector<8xf32> to vector<8x1xf32>
    %c0_24 = arith.constant 0 : index
    %c0_25 = arith.constant 0 : index
    %28 = vector.load %arg9[%c0_24, %c0_25] : memref<1x128xf32, #tpu.memory_space<vmem>>, vector<1x128xf32>
    %29 = vector.broadcast %27 : vector<8x1xf32> to vector<8x128xf32>
    %30 = vector.broadcast %28 : vector<1x128xf32> to vector<8x128xf32>
    %31 = arith.addf %29, %30 : vector<8x128xf32>
    %cst_26 = arith.constant 2.000000e+00 : f32
    %32 = vector.broadcast %cst_26 : f32 to vector<8x128xf32>
    %33 = arith.mulf %32, %24 : vector<8x128xf32>
    %34 = arith.subf %31, %33 : vector<8x128xf32>
    %cst_27 = arith.constant 0.000000e+00 : f32
    %35 = vector.broadcast %cst_27 : f32 to vector<8x128xf32>
    %36 = arith.maximumf %34, %35 : vector<8x128xf32>
    %cst_28 = arith.constant 1.000000e+00 : f32
    %37 = vector.broadcast %cst_28 : f32 to vector<8x128xf32>
    %38 = arith.addf %37, %36 : vector<8x128xf32>
    %39 = tpu.reciprocal %38 {approx = true} : vector<8x128xf32> -> vector<8x128xf32>
    %40 = tpu.iota {dimensions = array<i32: 1>} : vector<8x128xi32>
    %c8_i32 = arith.constant 8 : i32
    %41 = vector.broadcast %c8_i32 : i32 to vector<8x128xi32>
    %42 = arith.cmpi slt, %40, %41 : vector<8x128xi32>
    %cst_29 = arith.constant 0.000000e+00 : f32
    %43 = vector.broadcast %cst_29 : f32 to vector<8x128xf32>
    %44 = arith.select %42, %39, %43 : vector<8x128xi1>, vector<8x128xf32>
    %cst_30 = arith.constant dense<0.000000e+00> : vector<8xf32>
    %45 = vector.multi_reduction <add>, %44, %cst_30 [1] : vector<8x128xf32> to vector<8xf32>
    %46 = vector.shape_cast %45 : vector<8xf32> to vector<8x1xf32>
    %47 = tpu.reciprocal %46 {approx = true} : vector<8x1xf32> -> vector<8x1xf32>
    %48 = vector.broadcast %47 : vector<8x1xf32> to vector<8x128xf32>
    %49 = arith.mulf %44, %48 : vector<8x128xf32>
    %c0_31 = arith.constant 0 : index
    %c0_32 = arith.constant 0 : index
    %50 = vector.load %arg11[%c0_31, %c0_32] : memref<8x128xf32, #tpu.memory_space<vmem>>, vector<8x128xf32>
    tpu.vector_store %arg11[%c0_31, %c0_32], %49 {strides = array<i32>} : memref<8x128xf32, #tpu.memory_space<vmem>>, vector<8x128xf32>,
    return
  }
  func.func @transform_0(%arg0: i32) -> (i32, i32) {
    %c0_i32 = arith.constant 0 : i32
    %c0_i32_0 = arith.constant 0 : i32
    return %arg0, %c0_i32 : i32, i32
  }
  func.func @transform_1(%arg0: i32) -> (i32, i32) {
    %c0_i32 = arith.constant 0 : i32
    %c0_i32_0 = arith.constant 0 : i32
    %c0_i32_1 = arith.constant 0 : i32
    return %c0_i32, %c0_i32_0 : i32, i32
  }
  func.func @transform_2(%arg0: i32) -> (i32, i32) {
    %c0_i32 = arith.constant 0 : i32
    %c0_i32_0 = arith.constant 0 : i32
    %c0_i32_1 = arith.constant 0 : i32
    return %c0_i32, %c0_i32_0 : i32, i32
  }
  func.func @transform_3(%arg0: i32) -> (i32, i32) {
    %c0_i32 = arith.constant 0 : i32
    %c0_i32_0 = arith.constant 0 : i32
    %c0_i32_1 = arith.constant 0 : i32
    return %c0_i32, %c0_i32_0 : i32, i32
  }
  func.func @transform_4(%arg0: i32) -> (i32, i32) {
    %c0_i32 = arith.constant 0 : i32
    %c0_i32_0 = arith.constant 0 : i32
    %c0_i32_1 = arith.constant 0 : i32
    return %c0_i32, %c0_i32_0 : i32, i32
  }
  func.func @transform_5(%arg0: i32) -> (i32, i32) {
    %c0_i32 = arith.constant 0 : i32
    %c0_i32_0 = arith.constant 0 : i32
    %c0_i32_1 = arith.constant 0 : i32
    return %c0_i32, %c0_i32_0 : i32, i32
  }
  func.func @transform_6(%arg0: i32) -> (i32, i32) {
    %c0_i32 = arith.constant 0 : i32
    %c0_i32_0 = arith.constant 0 : i32
    %c0_i32_1 = arith.constant 0 : i32
    return %c0_i32, %c0_i32_0 : i32, i32
  }
  func.func @transform_7(%arg0: i32) -> (i32, i32) {
    %c0_i32 = arith.constant 0 : i32
    %c0_i32_0 = arith.constant 0 : i32
    %c0_i32_1 = arith.constant 0 : i32
    return %c0_i32, %c0_i32_0 : i32, i32
  }
  func.func @transform_8(%arg0: i32) -> (i32, i32) {
    %c0_i32 = arith.constant 0 : i32
    %c0_i32_0 = arith.constant 0 : i32
    %c0_i32_1 = arith.constant 0 : i32
    return %c0_i32, %c0_i32_0 : i32, i32
  }
  func.func @transform_9(%arg0: i32) -> (i32, i32) {
    %c0_i32 = arith.constant 0 : i32
    %c0_i32_0 = arith.constant 0 : i32
    return %arg0, %c0_i32 : i32, i32
  }
  func.func @transform_10(%arg0: i32) -> (i32, i32) {
    %c0_i32 = arith.constant 0 : i32
    %c0_i32_0 = arith.constant 0 : i32
    return %arg0, %c0_i32 : i32, i32
  }
}

</mosaic_0001>

<bundles_post_ra>
// kernel: tpu_custom_call.1
= control target key start
LH: loop header
LB: loop body
LE: loop exit
PB: predicated region body
PF: predicated region fallthrough
CT: control target
= control target key end

     0   :  { %16 = vsyncpa [#allocation3], 0  ;;  %s1231_s0 = inlined_call_operand.hbm [shape: f32[8,128], index: 0, kind: input, shape index: {}]   ;;  %s1232_s1 = inlined_call_operand.hbm [shape: f32[128,128], index: 1, kind: input, shape index: {}]   ;;  %s1233_s2 = inlined_call_operand.vmem [shape: f32[1,128], index: 2, kind: input, shape index: {}]   ;;  %s1234_s3 = inlined_call_operand.hbm [shape: f32[128,128], index: 3, kind: input, shape index: {}]   ;;  %s1235_s4 = inlined_call_operand.vmem [shape: f32[1,128], index: 4, kind: input, shape index: {}]   ;;  %s1236_s5 = inlined_call_operand.hbm [shape: f32[128,128], index: 5, kind: input, shape index: {}]   ;;  %s1237_s6 = inlined_call_operand.vmem [shape: f32[1,128], index: 6, kind: input, shape index: {}]   ;;  %s1238_s7 = inlined_call_operand.hbm [shape: f32[128,128], index: 7, kind: input, shape index: {}]   ;;  %s1239_s8 = inlined_call_operand.vmem [shape: f32[1,128], index: 8, kind: input, shape index: {}]   ;;  %s1240_s9 = inlined_call_operand.hbm [shape: f32[8,128], index: 9, kind: output, shape index: {0}]   ;;  %s1241_s10 = inlined_call_operand.hbm [shape: f32[8,128], index: 10, kind: output, shape index: {1}]  }
   0x1   :  { %17 = vsyncpa [#allocation6], 0 }
   0x2   :  { %18 = vsyncpa [#allocation9], 0 }
   0x3   :  { %19 = vsyncpa [#allocation4], 0 }
   0x4   :  { %20 = vsyncpa [#allocation13], 0  ;;  %s1016_s13 = smov [#allocation5]   ;;  %s852_s17 = scalar_lea.hbm %s1232_s1, 2048 }
   0x5   :  { %s36_s14 = sshll.u32 %s1016_s13, 4  ;;  %p853_p0 = scmp.ne.s32.totalorder %s1232_s1, %s852_s17  ;;  %s37_s14 = int_to_ptr.vmem [resolvable:$true] %s36_s14 }
   0x6   :  { %p856_p1 = scmp.lt.u32.totalorder %s852_s17, %s1232_s1 }
   0x8   :  { %p858_p2 = pnand %p856_p1, %p853_p0 }
   0xa   :  { %861 = shalt.err (!%p858_p2)
}
   0xb   :  { %s862_s22 = scalar_lea.vmem %s37_s14, 2048  ;;  %p867_p4 = scmp.lt.s32.totalorder %s37_s14, %s37_s14 }
   0xc   :  { %p863_p3 = scmp.ne.s32.totalorder %s37_s14, %s862_s22  ;;  %p868_p5 = scmp.lt.s32.totalorder %s862_s22, %s862_s22 }
   0xe   :  { %p869_p6 = por %p868_p5, %p867_p4 }
  0x10   :  { %p870_p7 = pnand %p869_p6, %p863_p3 }
  0x12   :  { %873 = shalt.err (!%p870_p7)
}
  0x13   :  { %s1017_s23 = smov 128   ;;  %s1018_s24 = smov 8  }
  0x14   :  { %42 = dma.hbm_to_vmem [thread:$0]  %s1232_s1, 2048, %s37_s14, [#allocation6], %s1017_s23, %s1017_s23, %s1018_s24  }
  0x15   :  { %s1019_s27 = smov [#allocation8]   ;;  %s1020_s29 = smov [#allocation2]  }
  0x16   :  { %s64_s28 = sshll.u32 %s1019_s27, 4  ;;  %s27_s30 = sshll.u32 %s1020_s29, 4  ;;  %s65_s28 = int_to_ptr.vmem [resolvable:$true] %s64_s28  ;;  %s28_s30 = int_to_ptr.vmem [resolvable:$true] %s27_s30 }
  0x17   :  { %s874_s13 = scalar_lea.hbm %s1236_s5, 2048 }
  0x18   :  { %p875_p8 = scmp.ne.s32.totalorder %s1236_s5, %s874_s13  ;;  %p878_p9 = scmp.lt.u32.totalorder %s874_s13, %s1236_s5 }
  0x1a   :  { %p880_p10 = pnand %p878_p9, %p875_p8 }
  0x1c   :  { %883 = shalt.err (!%p880_p10)
}
  0x1d   :  { %s884_s1 = scalar_lea.vmem %s65_s28, 2048  ;;  %p889_p12 = scmp.lt.s32.totalorder %s65_s28, %s65_s28 }
  0x1e   :  { %p885_p11 = scmp.ne.s32.totalorder %s65_s28, %s884_s1  ;;  %p890_p13 = scmp.lt.s32.totalorder %s884_s1, %s884_s1 }
  0x20   :  { %p891_p0 = por %p890_p13, %p889_p12 }
  0x22   :  { %p892_p1 = pnand %p891_p0, %p885_p11 }
  0x24   :  { %895 = shalt.err (!%p892_p1)
}
  0x25   :  { %70 = dma.hbm_to_vmem [thread:$0]  %s1236_s5, 2048, %s65_s28, [#allocation9], %s1017_s23, %s1017_s23, %s1018_s24  }
  0x26   :  { %s896_s22 = scalar_lea.hbm %s1231_s0, 128 }
  0x27   :  { %p897_p2 = scmp.ne.s32.totalorder %s1231_s0, %s896_s22  ;;  %p900_p3 = scmp.lt.u32.totalorder %s896_s22, %s1231_s0 }
  0x29   :  { %p902_p4 = pnand %p900_p3, %p897_p2 }
  0x2b   :  { %905 = shalt.err (!%p902_p4)
}
  0x2c   :  { %s906_s11 = scalar_lea.vmem %s28_s30, 128  ;;  %p911_p6 = scmp.lt.s32.totalorder %s28_s30, %s28_s30 }
  0x2d   :  { %p907_p5 = scmp.ne.s32.totalorder %s28_s30, %s906_s11  ;;  %p912_p7 = scmp.lt.s32.totalorder %s906_s11, %s906_s11 }
  0x2f   :  { %p913_p8 = por %p912_p7, %p911_p6 }
  0x31   :  { %p914_p9 = pnand %p913_p8, %p907_p5 }
  0x33   :  { %917 = shalt.err (!%p914_p9)
}
  0x34   :  { %30 = dma.hbm_to_vmem [thread:$0]  %s1231_s0, 128, %s28_s30, [#allocation3]  }
  0x35   :  { %s1021_s12 = smov [#allocation7]   ;;  %s1022_s15 = smov [#allocation10]  }
  0x36   :  { %s50_s13 = sshll.u32 %s1021_s12, 4  ;;  %s78_s16 = sshll.u32 %s1022_s15, 4  ;;  %s51_s13 = int_to_ptr.vmem [resolvable:$true] %s50_s13  ;;  %s79_s16 = int_to_ptr.vmem [resolvable:$true] %s78_s16 }
  0x37   :  { %s918_s1 = scalar_lea.hbm %s1234_s3, 2048 }
  0x38   :  { %p919_p10 = scmp.ne.s32.totalorder %s1234_s3, %s918_s1  ;;  %p922_p11 = scmp.lt.u32.totalorder %s918_s1, %s1234_s3 }
  0x3a   :  { %p924_p12 = pnand %p922_p11, %p919_p10 }
  0x3c   :  { %927 = shalt.err (!%p924_p12)
}
  0x3d   :  { %s928_s0 = scalar_lea.vmem %s51_s13, 2048  ;;  %p933_p0 = scmp.lt.s32.totalorder %s51_s13, %s51_s13 }
  0x3e   :  { %p929_p13 = scmp.ne.s32.totalorder %s51_s13, %s928_s0  ;;  %p934_p1 = scmp.lt.s32.totalorder %s928_s0, %s928_s0 }
  0x40   :  { %p935_p2 = por %p934_p1, %p933_p0 }
  0x42   :  { %p936_p3 = pnand %p935_p2, %p929_p13 }
  0x44   :  { %939 = shalt.err (!%p936_p3)
}
  0x45   :  { %56 = dma.hbm_to_vmem [thread:$0]  %s1234_s3, 2048, %s51_s13, [#allocation6], %s1017_s23, %s1017_s23, %s1018_s24  }
  0x46   :  { %s940_s27 = scalar_lea.hbm %s1238_s7, 2048 }
  0x47   :  { %p941_p4 = scmp.ne.s32.totalorder %s1238_s7, %s940_s27  ;;  %p944_p5 = scmp.lt.u32.totalorder %s940_s27, %s1238_s7 }
  0x49   :  { %p946_p6 = pnand %p944_p5, %p941_p4 }
  0x4b   :  { %949 = shalt.err (!%p946_p6)
}
  0x4c   :  { %s950_s12 = scalar_lea.vmem %s79_s16, 2048  ;;  %p955_p8 = scmp.lt.s32.totalorder %s79_s16, %s79_s16 }
  0x4d   :  { %p951_p7 = scmp.ne.s32.totalorder %s79_s16, %s950_s12  ;;  %p956_p9 = scmp.lt.s32.totalorder %s950_s12, %s950_s12 }
  0x4f   :  { %p957_p10 = por %p956_p9, %p955_p8 }
  0x51   :  { %p958_p11 = pnand %p957_p10, %p951_p7 }
  0x53   :  { %961 = shalt.err (!%p958_p11)
}
  0x54   :  { %84 = dma.hbm_to_vmem [thread:$0]  %s1238_s7, 2048, %s79_s16, [#allocation9], %s1017_s23, %s1017_s23, %s1018_s24  }
  0x55   :  { %1006 = dma.done.wait [#allocation3], 128  }
  0x56   :  { %1007 = vsyncadd [#allocation3], 4294967168 }
  0x57   :  { %1008 = dma.done.wait [#allocation6], 4096  }
  0x58   :  { %1009 = vsyncadd [#allocation6], 4294963200 }
  0x59   :  { %1010 = dma.done.wait [#allocation9], 4096  }
  0x5a   :  { %1011 = vsyncadd [#allocation9], 4294963200  ;;  %v1023_v0 = vmov 0.0|0.0   ;;  %vm1024_vm0 = vmmov 0   ;;  %v1025_v1 = vmov 0.0   ;;  %v103_v2 = vld [vmem:[#allocation5] sm:$0xff] }
  0x5b   :  { %740 = vmatprep.subr.bf16.mxu0 %v1023_v0  ;;  %632 = vmatprep.mubr.msk.f32.mxu0 %vm1024_vm0, %v1025_v1  ;;  %v104_v3 = vld [vmem:[#allocation5 + $0x8] sm:$0xff]  ;;  %v105_v4 = vld [vmem:[#allocation5 + $0x10] sm:$0xff]  ;;  %v106_v6 = vld [vmem:[#allocation5 + $0x18] sm:$0xff] }
  0x5c   :  { %764 = vmatprep.subr.bf16.mxu1 %v1023_v0  ;;  %667 = vmatprep.mubr.msk.f32.mxu1 %vm1024_vm0, %v1025_v1  ;;  %v741_v5 = vpack.c.bf16 %v104_v3, %v103_v2  ;;  %v744_v7 = vpack.c.bf16 %v106_v6, %v105_v4  ;;  %v107_v8 = vld [vmem:[#allocation5 + $0x20] sm:$0xff]  ;;  %v108_v9 = vld [vmem:[#allocation5 + $0x28] sm:$0xff]  ;;  %v199_v12 = vld [vmem:[#allocation7 + $0x10] sm:$0xff] }
  0x5d   :  { %v197_v10 = vld [vmem:[#allocation7] sm:$0xff]  ;;  %v198_v11 = vld [vmem:[#allocation7 + $0x8] sm:$0xff]  ;;  %v200_v13 = vld [vmem:[#allocation7 + $0x18] sm:$0xff]  ;;  %v747_v14 = vpack.c.bf16 %v108_v9, %v107_v8 }
  0x5e   :  { %742 = vmatpush3.bf16.msra.mxu0 %v741_v5  ;;  %v765_v15 = vpack.c.bf16 %v198_v11, %v197_v10  ;;  %v109_v16 = vld [vmem:[#allocation5 + $0x30] sm:$0xff]  ;;  %v110_v17 = vld [vmem:[#allocation5 + $0x38] sm:$0xff]  ;;  %v768_v18 = vpack.c.bf16 %v200_v13, %v199_v12  ;;  %v201_v19 = vld [vmem:[#allocation7 + $0x20] sm:$0xff] }
  0x5f   :  { %743 = vmatprep.subr.bf16.mxu0 %v1023_v0  ;;  %v202_v20 = vld [vmem:[#allocation7 + $0x28] sm:$0xff]  ;;  %v750_v21 = vpack.c.bf16 %v110_v17, %v109_v16  ;;  %v111_v22 = vld [vmem:[#allocation5 + $0x40] sm:$0xff]  ;;  %v203_v25 = vld [vmem:[#allocation7 + $0x30] sm:$0xff] }
  0x60   :  { %766 = vmatpush3.bf16.msra.mxu1 %v765_v15  ;;  %v112_v23 = vld [vmem:[#allocation5 + $0x48] sm:$0xff]  ;;  %v771_v24 = vpack.c.bf16 %v202_v20, %v201_v19  ;;  %v204_v26 = vld [vmem:[#allocation7 + $0x38] sm:$0xff]  ;;  %v113_v28 = vld [vmem:[#allocation5 + $0x50] sm:$0xff] }
  0x61   :  { %767 = vmatprep.subr.bf16.mxu1 %v1023_v0  ;;  %v753_v27 = vpack.c.bf16 %v112_v23, %v111_v22  ;;  %v114_v29 = vld [vmem:[#allocation5 + $0x58] sm:$0xff]  ;;  %v774_v30 = vpack.c.bf16 %v204_v26, %v203_v25  ;;  %v205_v31 = vld [vmem:[#allocation7 + $0x40] sm:$0xff]  ;;  %v206_v32 = vld [vmem:[#allocation7 + $0x48] sm:$0xff] }
  0x62   :  { %745 = vmatpush3.bf16.msra.mxu0 %v744_v7  ;;  %v756_v33 = vpack.c.bf16 %v114_v29, %v113_v28  ;;  %v115_v34 = vld [vmem:[#allocation5 + $0x60] sm:$0xff]  ;;  %v116_v35 = vld [vmem:[#allocation5 + $0x68] sm:$0xff]  ;;  %v777_v36 = vpack.c.bf16 %v206_v32, %v205_v31  ;;  %v207_v37 = vld [vmem:[#allocation7 + $0x50] sm:$0xff] }
  0x63   :  { %746 = vmatprep.subr.bf16.mxu0 %v1023_v0  ;;  %v208_v38 = vld [vmem:[#allocation7 + $0x58] sm:$0xff]  ;;  %v759_v39 = vpack.c.bf16 %v116_v35, %v115_v34  ;;  %v117_v40 = vld [vmem:[#allocation5 + $0x70] sm:$0xff]  ;;  %v209_v43 = vld [vmem:[#allocation7 + $0x60] sm:$0xff] }
  0x64   :  { %769 = vmatpush3.bf16.msra.mxu1 %v768_v18  ;;  %v118_v41 = vld [vmem:[#allocation5 + $0x78] sm:$0xff]  ;;  %v780_v42 = vpack.c.bf16 %v208_v38, %v207_v37  ;;  %v210_v44 = vld [vmem:[#allocation7 + $0x68] sm:$0xff]  ;;  %v211_v48 = vld [vmem:[#allocation7 + $0x70] sm:$0xff] }
  0x65   :  { %770 = vmatprep.subr.bf16.mxu1 %v1023_v0  ;;  %v762_v45 = vpack.c.bf16 %v118_v41, %v117_v40  ;;  %v783_v46 = vpack.c.bf16 %v210_v44, %v209_v43  ;;  %v102_v47 = vld [vmem:[#allocation2] sm:$0xff]  ;;  %v291_v51 = vld [vmem:[#allocation8] sm:$0xff]  ;;  %v292_v52 = vld [vmem:[#allocation8 + $0x8] sm:$0xff] }
  0x66   :  { %748 = vmatpush3.bf16.msra.mxu0 %v747_v14  ;;  %v212_v49 = vld [vmem:[#allocation7 + $0x78] sm:$0xff]  ;;  %v293_v53 = vld [vmem:[#allocation8 + $0x10] sm:$0xff]  ;;  %v789_v54 = vpack.c.bf16 %v292_v52, %v291_v51  ;;  %v295_v57 = vld [vmem:[#allocation8 + $0x20] sm:$0xff] }
  0x67   :  { %749 = vmatprep.subr.bf16.mxu0 %v1023_v0  ;;  %v786_v50 = vpack.c.bf16 %v212_v49, %v211_v48  ;;  %v294_v55 = vld [vmem:[#allocation8 + $0x18] sm:$0xff]  ;;  %v296_v58 = vld [vmem:[#allocation8 + $0x28] sm:$0xff]  ;;  %v297_v60 = vld [vmem:[#allocation8 + $0x30] sm:$0xff] }
  0x68   :  { %772 = vmatpush3.bf16.msra.mxu1 %v771_v24  ;;  %v792_v56 = vpack.c.bf16 %v294_v55, %v293_v53  ;;  %v795_v59 = vpack.c.bf16 %v296_v58, %v295_v57  ;;  %v298_v61 = vld [vmem:[#allocation8 + $0x38] sm:$0xff]  ;;  %v299_v63 = vld [vmem:[#allocation8 + $0x40] sm:$0xff]  ;;  %v300_v2 = vld [vmem:[#allocation8 + $0x48] sm:$0xff] }
  0x69   :  { %773 = vmatprep.subr.bf16.mxu1 %v1023_v0  ;;  %v798_v62 = vpack.c.bf16 %v298_v61, %v297_v60  ;;  %v801_v3 = vpack.c.bf16 %v300_v2, %v299_v63  ;;  %v301_v4 = vld [vmem:[#allocation8 + $0x50] sm:$0xff]  ;;  %v302_v5 = vld [vmem:[#allocation8 + $0x58] sm:$0xff]  ;;  %v303_v7 = vld [vmem:[#allocation8 + $0x60] sm:$0xff]  ;;  %v488_v60 = vlaneseq }
  0x6a   :  { %751 = vmatpush3.bf16.msra.mxu0 %v750_v21  ;;  %v804_v6 = vpack.c.bf16 %v302_v5, %v301_v4  ;;  %v304_v8 = vld [vmem:[#allocation8 + $0x68] sm:$0xff]  ;;  %v528_v10 = vld [vmem:[%s1233_s2] ss:$0 sm:$0xff]  ;;  %v305_v15 = vld [vmem:[#allocation8 + $0x70] sm:$0xff] }
  0x6b   :  { %752 = vmatprep.subr.bf16.mxu0 %v1023_v0  ;;  %v807_v9 = vpack.c.bf16 %v304_v8, %v303_v7  ;;  %v306_v16 = vld [vmem:[#allocation8 + $0x78] sm:$0xff]  ;;  %v386_v18 = vld [vmem:[#allocation10] sm:$0xff]  ;;  %v387_v19 = vld [vmem:[#allocation10 + $0x8] sm:$0xff]  ;;  %v489_v61 = vand.u32 127, %v488_v60 }
  0x6c   :  { %775 = vmatpush3.bf16.msra.mxu1 %v774_v30  ;;  %v810_v17 = vpack.c.bf16 %v306_v16, %v305_v15  ;;  %v388_v20 = vld [vmem:[#allocation10 + $0x10] sm:$0xff]  ;;  %v813_v21 = vpack.c.bf16 %v387_v19, %v386_v18  ;;  %v389_v22 = vld [vmem:[#allocation10 + $0x18] sm:$0xff]  ;;  %v390_v24 = vld [vmem:[#allocation10 + $0x20] sm:$0xff] }
  0x6d   :  { %776 = vmatprep.subr.bf16.mxu1 %v1023_v0  ;;  %v816_v23 = vpack.c.bf16 %v389_v22, %v388_v20  ;;  %v391_v25 = vld [vmem:[#allocation10 + $0x28] sm:$0xff]  ;;  %v394_v29 = vld [vmem:[#allocation10 + $0x40] sm:$0xff]  ;;  %v396_v32 = vld [vmem:[#allocation10 + $0x50] sm:$0xff]  ;;  %vm490_vm1 = vcmp.lt.s32.totalorder %v489_v61, 8 }
  0x6e   :  { %754 = vmatpush3.bf16.msra.mxu0 %v753_v27  ;;  %v819_v26 = vpack.c.bf16 %v391_v25, %v390_v24  ;;  %v393_v27 = vld [vmem:[#allocation10 + $0x38] sm:$0xff]  ;;  %v395_v30 = vld [vmem:[#allocation10 + $0x48] sm:$0xff]  ;;  %v398_v35 = vld [vmem:[#allocation10 + $0x60] sm:$0xff] }
  0x6f   :  { %755 = vmatprep.subr.bf16.mxu0 %v1023_v0  ;;  %v825_v31 = vpack.c.bf16 %v395_v30, %v394_v29  ;;  %v529_v38 = vld [vmem:[%s1235_s4] ss:$0 sm:$0xff]  ;;  %v400_v43 = vld [vmem:[#allocation10 + $0x70] sm:$0xff] }
  0x70   :  { %778 = vmatpush3.bf16.msra.mxu1 %v777_v36  ;;  %v399_v36 = vld [vmem:[#allocation10 + $0x68] sm:$0xff]  ;;  %v401_v44 = vld [vmem:[#allocation10 + $0x78] sm:$0xff] }
  0x71   :  { %779 = vmatprep.subr.bf16.mxu1 %v1023_v0  ;;  %v831_v37 = vpack.c.bf16 %v399_v36, %v398_v35  ;;  %v531_v51 = vld [vmem:[%s1239_s8] ss:$0 sm:$0xff] }
  0x72   :  { %757 = vmatpush3.bf16.msra.mxu0 %v756_v33  ;;  %v397_v33 = vld [vmem:[#allocation10 + $0x58] sm:$0xff] }
  0x73   :  { %758 = vmatprep.subr.bf16.mxu0 %v1023_v0  ;;  %v828_v34 = vpack.c.bf16 %v397_v33, %v396_v32 }
  0x74   :  { %781 = vmatpush3.bf16.msra.mxu1 %v780_v42 }
  0x75   :  { %782 = vmatprep.subr.bf16.mxu1 %v1023_v0 }
  0x76   :  { %760 = vmatpush3.bf16.msra.mxu0 %v759_v39 }
  0x77   :  { %761 = vmatprep.subr.bf16.mxu0 %v1023_v0 }
  0x78   :  { %784 = vmatpush3.bf16.msra.mxu1 %v783_v46  ;;  %v530_v46 = vld [vmem:[%s1237_s6] ss:$0 sm:$0xff]  ;;  %s1026_s6 = smov [#allocation11]  }
  0x79   :  { %785 = vmatprep.subr.bf16.mxu1 %v1023_v0  ;;  %s503_s18 = sshll.u32 %s1026_s6, 4  ;;  %s504_s18 = int_to_ptr.vmem [resolvable:$true] %s503_s18 }
  0x7a   :  { %763 = vmatpush3.bf16.msra.mxu0 %v762_v45  ;;  %v834_v45 = vpack.c.bf16 %v401_v44, %v400_v43  ;;  %s962_s1 = scalar_lea.vmem %s504_s18, 128  ;;  %p967_p13 = scmp.lt.s32.totalorder %s504_s18, %s504_s18 }
  0x7b   :  { %788 = vmatprep.subr.bf16.mxu0 %v1023_v0  ;;  %p963_p12 = scmp.ne.s32.totalorder %s504_s18, %s962_s1  ;;  %p968_p0 = scmp.lt.s32.totalorder %s962_s1, %s962_s1 }
  0x7c   :  { %787 = vmatpush3.bf16.msra.mxu1 %v786_v50 }
  0x7d   :  { %633 = vmatmul.mubr.f32.vlgmr.msra.gmra.mrb[0].mxu0 %v102_v47  ;;  %812 = vmatprep.subr.bf16.mxu1 %v1023_v0  ;;  %p969_p1 = por %p968_p0, %p967_p13 }
  0x7e   :  { %702 = vmatprep.mubr.msk.f32.mxu0 %vm1024_vm0, %v1025_v1  ;;  %790 = vmatpush3.bf16.msra.mxu0 %v789_v54 }
  0x7f   :  { %791 = vmatprep.subr.bf16.mxu0 %v1023_v0  ;;  %p970_p2 = pnand %p969_p1, %p963_p12 }
  0x82   :  { %793 = vmatpush3.bf16.msra.mxu0 %v792_v56 }
  0x83   :  { %794 = vmatprep.subr.bf16.mxu0 %v1023_v0 }
  0x86   :  { %796 = vmatpush3.bf16.msra.mxu0 %v795_v59 }
  0x87   :  { %797 = vmatprep.subr.bf16.mxu0 %v1023_v0 }
  0x8a   :  { %799 = vmatpush3.bf16.msra.mxu0 %v798_v62 }
  0x8b   :  { %800 = vmatprep.subr.bf16.mxu0 %v1023_v0 }
  0x8e   :  { %802 = vmatpush3.bf16.msra.mxu0 %v801_v3 }
  0x8f   :  { %803 = vmatprep.subr.bf16.mxu0 %v1023_v0 }
  0x92   :  { %805 = vmatpush3.bf16.msra.mxu0 %v804_v6 }
  0x93   :  { %806 = vmatprep.subr.bf16.mxu0 %v1023_v0 }
  0x96   :  { %808 = vmatpush3.bf16.msra.mxu0 %v807_v9 }
  0x97   :  { %809 = vmatprep.subr.bf16.mxu0 %v1023_v0 }
  0x9a   :  { %811 = vmatpush3.bf16.msra.mxu0 %v810_v17 }
 0x150   :  { %v192_v11 = vpop.f32.mrb[0].mxu0 }
 0x151   :  { %v193_v12 = vadd.f32 %v528_v10, %v192_v11  ;;  %v634_v13 = vpop.f32.mrb[1].mxu0 }
 0x153   :  { %v196_v14 = vmax.f32 %v193_v12, 0.0 }
 0x155   :  { %668 = vmatmul.mubr.f32.vlgmr.msra.gmra.mrb[0].mxu1 %v196_v14 }
 0x156   :  { %737 = vmatprep.mubr.msk.f32.mxu1 %vm1024_vm0, %v1025_v1  ;;  %814 = vmatpush3.bf16.msra.mxu1 %v813_v21  ;;  %v392_v1 = vld [vmem:[#allocation10 + $0x30] sm:$0xff] }
 0x157   :  { %815 = vmatprep.subr.bf16.mxu1 %v1023_v0  ;;  %v822_v28 = vpack.c.bf16 %v393_v27, %v392_v1 }
 0x15a   :  { %817 = vmatpush3.bf16.msra.mxu1 %v816_v23 }
 0x15b   :  { %818 = vmatprep.subr.bf16.mxu1 %v1023_v0 }
 0x15e   :  { %820 = vmatpush3.bf16.msra.mxu1 %v819_v26 }
 0x15f   :  { %821 = vmatprep.subr.bf16.mxu1 %v1023_v0 }
 0x162   :  { %823 = vmatpush3.bf16.msra.mxu1 %v822_v28 }
 0x163   :  { %824 = vmatprep.subr.bf16.mxu1 %v1023_v0 }
 0x166   :  { %826 = vmatpush3.bf16.msra.mxu1 %v825_v31 }
 0x167   :  { %827 = vmatprep.subr.bf16.mxu1 %v1023_v0 }
 0x16a   :  { %829 = vmatpush3.bf16.msra.mxu1 %v828_v34 }
 0x16b   :  { %830 = vmatprep.subr.bf16.mxu1 %v1023_v0 }
 0x16e   :  { %832 = vmatpush3.bf16.msra.mxu1 %v831_v37 }
 0x16f   :  { %833 = vmatprep.subr.bf16.mxu1 %v1023_v0 }
 0x172   :  { %835 = vmatpush3.bf16.msra.mxu1 %v834_v45 }
 0x228   :  { %v286_v39 = vpop.f32.mrb[0].mxu1 }
 0x229   :  { %v287_v40 = vadd.f32 %v529_v38, %v286_v39  ;;  %v669_v41 = vpop.f32.mrb[1].mxu1 }
 0x22b   :  { %v290_v42 = vmax.f32 %v287_v40, 0.0 }
 0x22d   :  { %703 = vmatmul.mubr.f32.vlgmr.msra.gmra.mrb[2].mxu0 %v290_v42 }
 0x300   :  { %v380_v47 = vpop.f32.mrb[2].mxu0 }
 0x301   :  { %v381_v48 = vadd.f32 %v530_v46, %v380_v47  ;;  %v704_v0 = vpop.f32.mrb[3].mxu0 }
 0x303   :  { %v384_v49 = vmax.f32 %v381_v48, 0.0 }
 0x305   :  { %385 = vst [vmem:[#allocation11] sm:$0xff] %v384_v49  ;;  %738 = vmatmul.mubr.f32.vlgmr.msra.gmra.mrb[2].mxu1 %v384_v49  ;;  %v472_v50 = vmul.f32 %v384_v49, %v384_v49 }
 0x307   :  { %473 = vadd.xlane.f32.xlu0 %v472_v50 }
 0x394   :  { %v474_v52 = vpop.xlane.xlu0 %473 }
 0x395   :  { %v482_v54 = vadd.f32 %v531_v51, %v474_v52 }
 0x3d8   :  { %v468_v53 = vpop.f32.mrb[2].mxu1 }
 0x3d9   :  { %v483_v55 = vmul.f32 2.0, %v468_v53  ;;  %v739_v56 = vpop.f32.mrb[3].mxu1 }
 0x3db   :  { %v484_v57 = vsub.f32 %v482_v54, %v483_v55 }
 0x3dd   :  { %v485_v58 = vmax.f32 %v484_v57, 0.0 }
 0x3df   :  { %v486_v59 = vadd.f32 1.0, %v485_v58 }
 0x3e1   :  { %848 = vrcp.f32 %v486_v59 }
 0x3eb   :  { %v849_v62 = vpop.eup %848 }
 0x3ec   :  { %v491_v63 = vsel %vm490_vm1, %v849_v62, 0.0 }
 0x3ed   :  { %492 = vadd.xlane.f32.xlu0 %v491_v63 }
 0x3ee   :  { %973 = shalt.err (!%p970_p2)
}
 0x3ef   :  { %s974_s19 = scalar_lea.hbm %s1240_s9, 128 }
 0x3f0   :  { %p975_p3 = scmp.ne.s32.totalorder %s1240_s9, %s974_s19  ;;  %p978_p4 = scmp.lt.u32.totalorder %s974_s19, %s1240_s9 }
 0x3f2   :  { %p980_p5 = pnand %p978_p4, %p975_p3 }
 0x3f4   :  { %983 = shalt.err (!%p980_p5)
}
 0x3f5   :  { %506 = dma.vmem_to_hbm [thread:$0]  %s504_s18, 128, %s1240_s9, [#allocation4]  }
 0x3f6   :  { %s1027_s26 = smov [#allocation12]  }
 0x3f7   :  { %s513_s27 = sshll.u32 %s1027_s26, 4  ;;  %s514_s27 = int_to_ptr.vmem [resolvable:$true] %s513_s27 }
 0x3f8   :  { %s984_s29 = scalar_lea.vmem %s514_s27, 128  ;;  %p989_p7 = scmp.lt.s32.totalorder %s514_s27, %s514_s27 }
 0x3f9   :  { %p985_p6 = scmp.ne.s32.totalorder %s514_s27, %s984_s29  ;;  %p990_p8 = scmp.lt.s32.totalorder %s984_s29, %s984_s29 }
 0x3fb   :  { %p991_p9 = por %p990_p8, %p989_p7 }
 0x3fd   :  { %p992_p10 = pnand %p991_p9, %p985_p6 }
 0x47a   :  { %v493_v2 = vpop.xlane.xlu0 %492 }
 0x47b   :  { %850 = vrcp.f32 %v493_v2 }
 0x485   :  { %v851_v3 = vpop.eup %850 }
 0x486   :  { %v495_v4 = vmul.f32 %v851_v3, %v491_v63 }
 0x488   :  { %496 = vst [vmem:[#allocation12] sm:$0xff] %v495_v4 }
 0x489   :  { %995 = shalt.err (!%p992_p10)
}
 0x48a   :  { %s996_s28 = scalar_lea.hbm %s1241_s10, 128 }
 0x48b   :  { %p997_p11 = scmp.ne.s32.totalorder %s1241_s10, %s996_s28  ;;  %p1000_p12 = scmp.lt.u32.totalorder %s996_s28, %s1241_s10 }
 0x48d   :  { %p1002_p13 = pnand %p1000_p12, %p997_p11 }
 0x48f   :  { %1005 = shalt.err (!%p1002_p13)
}
 0x490   :  { %516 = dma.vmem_to_hbm [thread:$0]  %s514_s27, 128, %s1241_s10, [#allocation13]  }
 0x491   :  { %1012 = dma.done.wait [#allocation4], 128  }
 0x492   :  { %1013 = vsyncadd [#allocation4], 4294967168 }
 0x493   :  { %1014 = dma.done.wait [#allocation13], 128  }
 0x494   :  { %1015 = vsyncadd [#allocation13], 4294967168 }
 0x495   :  { %523 = vsyncpa [#allocation3], 1 }
 0x496   :  { %524 = vsyncpa [#allocation6], 1 }
 0x497   :  { %525 = vsyncpa [#allocation9], 1 }
 0x498   :  { %526 = vsyncpa [#allocation4], 1 }
 0x499   :  { %527 = vsyncpa [#allocation13], 1 }

</bundles_post_ra>
